<compile_context>
chip_gen: v6e
topology: v6e:2x2x1
jax: 0.10.0
libtpu: 0.0.40
codegen_flags: <defaults>
</compile_context>

<pallas_src>
import functools

import jax
import jax.numpy as jnp
from jax.experimental import pallas as pl
from jax.experimental.pallas import tpu as pltpu

_EPS = 1e-08
_LANES = 128
_SUBLANES = 8


def _num_tensorcores():
    """Best-effort TensorCore count of the local device (2 on megacore chips)."""
    try:
        dev = jax.devices()[0]
        kind = str(getattr(dev, "device_kind", "")).lower()
        if "v7" in kind or "v4" in kind:   # megacore: 2 TCs behind one device
            return 2
        nc = getattr(dev, "num_cores", None)
        if nc:
            return max(1, int(nc))
    except Exception:
        pass
    return 1


def _msle_kernel(x_ref, y_ref, o_ref, acc_ref, *,
                 rows_valid, tile_rows, tiles_per_split, total_tiles,
                 needs_mask, grid_padded):
    p = pl.program_id(0)
    i = pl.program_id(1)
    block_idx = p * tiles_per_split + i          # UNclamped logical block index

    # Zero the running vreg-shaped sum at the start of each split's sweep.
    @pl.when(i == 0)
    def _init():
        acc_ref[...] = jnp.zeros_like(acc_ref)

    c = jnp.float32(1.0 + _EPS)

    def tile_partial_sum(mask_rows):
        x = x_ref[...].astype(jnp.float32)
        y = y_ref[...].astype(jnp.float32)
        if mask_rows:
            # Only the last real tile pays for the mask.  Rows past the end of
            # the array are replaced by 1.0 in both inputs => contribution 0.
            row_ids = block_idx * tile_rows + jax.lax.broadcasted_iota(
                jnp.int32, (tile_rows, _LANES), 0)
            valid = row_ids < rows_valid
            x = jnp.where(valid, x, 1.0)
            y = jnp.where(valid, y, 1.0)
        d = jnp.log(x + c) - jnp.log(y + c)
        dd = d * d
        # vreg-granular partial reduction: pure VPU elementwise adds.
        return jnp.sum(
            dd.reshape(tile_rows // _SUBLANES, _SUBLANES, _LANES), axis=0)

    if not needs_mask and not grid_padded:
        # Common path: every tile is full and real.
        acc_ref[...] += tile_partial_sum(False)
    else:
        full_limit = total_tiles - 1 if needs_mask else total_tiles

        if full_limit > 0:
            @pl.when(block_idx < full_limit)
            def _full():
                acc_ref[...] += tile_partial_sum(False)

        if needs_mask:
            @pl.when(block_idx == total_tiles - 1)
            def _ragged():
                acc_ref[...] += tile_partial_sum(True)
        # Phantom steps (block_idx >= total_tiles, only when the grid is
        # padded for the 2-way split) hit neither branch and contribute 0.

    # Finalize: single cross-lane/sublane reduce to this split's partial sum.
    @pl.when(i == pl.num_programs(1) - 1)
    def _fin():
        o_ref[...] = jnp.sum(acc_ref[...], keepdims=True)


def _msle_sum_2d(x2d, y2d, *, tile_rows):
    """Sum over all elements of (log(x+c) - log(y+c))^2 for a (rows,128) slab."""
    rows = x2d.shape[0]
    n_elems = rows * _LANES

    # Tile sizing: big streaming tiles, multiple of 8 sublanes, never larger
    # than the (sublane-rounded) row count.
    rows_up = pl.cdiv(rows, _SUBLANES) * _SUBLANES
    tr = min(int(tile_rows), rows_up)
    tr = max(_SUBLANES, (tr // _SUBLANES) * _SUBLANES)

    total_tiles = pl.cdiv(rows, tr)
    num_splits = min(_num_tensorcores(), total_tiles)   # 2 on v7x/v4, 1 on v5e/v6e
    tiles_per_split = pl.cdiv(total_tiles, num_splits)
    grid_padded = (num_splits * tiles_per_split) != total_tiles
    needs_mask = (total_tiles * tr) != rows
    last_block = total_tiles - 1

    if grid_padded:
        # Clamp so the phantom step's DMA stays in bounds (its accumulation is
        # skipped in-kernel; the repeated block index also lets Pallas skip the
        # redundant DMA).
        def in_map(p, i):
            return (jnp.minimum(p * tiles_per_split + i, last_block), 0)
    else:
        def in_map(p, i):
            return (p * tiles_per_split + i, 0)

    kernel = functools.partial(
        _msle_kernel,
        rows_valid=rows,
        tile_rows=tr,
        tiles_per_split=tiles_per_split,
        total_tiles=total_tiles,
        needs_mask=needs_mask,
        grid_padded=grid_padded,
    )

    itemsize = jnp.dtype(x2d.dtype).itemsize
    block_in_bytes = tr * _LANES * itemsize
    # Budget: 2 inputs x 2 pipeline buffers + f32 temporaries headroom + slack,
    # floored at the smallest default scoped limit and capped under v7x's
    # 64 MiB physical VMEM.
    vmem_limit = 2 * 2 * block_in_bytes + 6 * tr * _LANES * 4 + (2 << 20)
    vmem_limit = int(min(max(vmem_limit, 16 << 20), 60 << 20))

    cost = pl.CostEstimate(
        flops=6 * n_elems,
        transcendentals=2 * n_elems,
        bytes_accessed=2 * n_elems * itemsize,
    )

    partials = pl.pallas_call(
        kernel,
        out_shape=jax.ShapeDtypeStruct((num_splits, 1), jnp.float32),
        grid_spec=pltpu.PrefetchScalarGridSpec(
            num_scalar_prefetch=0,
            grid=(num_splits, tiles_per_split),
            in_specs=[
                pl.BlockSpec((tr, _LANES), in_map),
                pl.BlockSpec((tr, _LANES), in_map),
            ],
            out_specs=pl.BlockSpec((1, 1), lambda p, i: (p, 0)),
            scratch_shapes=[pltpu.VMEM((_SUBLANES, _LANES), jnp.float32)],
        ),
        compiler_params=pltpu.CompilerParams(
            dimension_semantics=("parallel", "arbitrary"),
            vmem_limit_bytes=vmem_limit,
        ),
        cost_estimate=cost,
    )(x2d, y2d)

    return jnp.sum(partials)


def msle_loss(inp, tgt, *, tile_rows=8192):
    """mean((log(inp + 1e-8 + 1) - log(tgt + 1e-8 + 1))**2), accumulated in f32."""
    assert inp.shape == tgt.shape, "input/target shapes must match"
    n = int(inp.size)
    assert n > 0

    x_flat = inp.reshape(-1)
    y_flat = tgt.reshape(-1)

    main = (n // _LANES) * _LANES
    tail = n - main

    total_sq = jnp.float32(0.0)

    if main > 0:
        if tail == 0:
            # Fast path: pure reshape, no copy, original dtype.
            x2d = x_flat.reshape(-1, _LANES)
            y2d = y_flat.reshape(-1, _LANES)
        else:
            # TODO(synk): a truly zero-copy ragged path would need manual DMA
            # from a flat pl.ANY ref; this prefix slice is one bounded copy.
            x2d = jax.lax.slice(x_flat, (0,), (main,)).reshape(-1, _LANES)
            y2d = jax.lax.slice(y_flat, (0,), (main,)).reshape(-1, _LANES)
        total_sq = total_sq + _msle_sum_2d(x2d, y2d, tile_rows=tile_rows)

    if tail > 0:
        # Tiny (<128-element) tail handled in plain jnp and combined.
        xt = jax.lax.slice(x_flat, (main,), (n,)).astype(jnp.float32)
        yt = jax.lax.slice(y_flat, (main,), (n,)).astype(jnp.float32)
        c = jnp.float32(1.0 + _EPS)
        dt = jnp.log(xt + c) - jnp.log(yt + c)
        total_sq = total_sq + jnp.sum(dt * dt)

    return total_sq / n


def _ref_loss(x, y):
    c = _EPS + 1.0
    d = jnp.log(x.astype(jnp.float32) + c) - jnp.log(y.astype(jnp.float32) + c)
    return jnp.mean(d * d)


if __name__ == "__main__":
    key = jax.random.PRNGKey(0)

    # 1) NCHW-like shape, n % 1024 == 0 -> zero-copy fast path.
    k1, k2, k3, k4, k5, k6 = jax.random.split(key, 6)
    shape = (2, 4, 16, 16)
    inp = jax.random.uniform(k1, shape, dtype=jnp.float32) * 5.0
    tgt = jax.random.uniform(k2, shape, dtype=jnp.float32) * 5.0
    loss = msle_loss(inp, tgt)
    jax.block_until_ready(loss)
    ref = _ref_loss(inp, tgt)
    assert jnp.allclose(loss, ref, rtol=1e-5, atol=1e-6), (loss, ref)

    # 2) Ragged element count (n = 1155): kernel prefix + jnp tail combine.
    shape2 = (3, 5, 7, 11)
    inp2 = jax.random.uniform(k3, shape2, dtype=jnp.float32) * 3.0
    tgt2 = jax.random.uniform(k4, shape2, dtype=jnp.float32) * 3.0
    loss2 = msle_loss(inp2, tgt2)
    jax.block_until_ready(loss2)
    ref2 = _ref_loss(inp2, tgt2)
    assert jnp.allclose(loss2, ref2, rtol=1e-5, atol=1e-6), (loss2, ref2)

    # 3) Multi-tile streaming loop (tiny tile_rows override) with ragged rows:
    #    exercises accumulation across grid steps, the last-tile row mask, and
    #    (on multi-TC chips) the clamped phantom-step path.
    shape3 = (42, 128)
    inp3 = jax.random.uniform(k5, shape3, dtype=jnp.float32) * 2.0
    tgt3 = jax.random.uniform(k6, shape3, dtype=jnp.float32) * 2.0
    loss3 = msle_loss(inp3, tgt3, tile_rows=8)
    jax.block_until_ready(loss3)
    ref3 = _ref_loss(inp3, tgt3)
    assert jnp.allclose(loss3, ref3, rtol=1e-5, atol=1e-6), (loss3, ref3)

    print("KERNEL_OK")
</pallas_src>

<mosaic_0001>
module attributes {stable_mosaic.version = 11 : i64} {
  func.func @_msle_kernel(%arg0: i32, %arg1: i32, %arg2: memref<16x128xf32, #tpu.memory_space<vmem>>, %arg3: memref<16x128xf32, #tpu.memory_space<vmem>>, %arg4: memref<1x1xf32, #tpu.memory_space<vmem>>, %arg5: memref<8x128xf32, #tpu.memory_space<vmem>>) attributes {dimension_semantics = [#tpu.dimension_semantics<parallel>, #tpu.dimension_semantics<arbitrary>], iteration_bounds = array<i64: 1, 1>, scalar_prefetch = 0 : i64, scratch_operands = 1 : i64, tpu.core_type = #tpu.core_type<tc>, window_params = [{transform_indices = @transform_0, window_bounds = array<i64: 16, 128>}, {transform_indices = @transform_1, window_bounds = array<i64: 16, 128>}, {transform_indices = @transform_2, window_bounds = array<i64: 1, 1>}]} {
    %c0_i32 = arith.constant 0 : i32
    %0 = arith.cmpi eq, %arg1, %c0_i32 : i32
    %1 = arith.extui %0 : i1 to i32
    %c0_i32_0 = arith.constant 0 : i32
    %2 = arith.cmpi ne, %1, %c0_i32_0 : i32
    scf.if %2 {
      %cst_12 = arith.constant 0.000000e+00 : f32
      %21 = vector.broadcast %cst_12 : f32 to vector<8x128xf32>
      %c0_13 = arith.constant 0 : index
      %c0_14 = arith.constant 0 : index
      %22 = vector.load %arg5[%c0_13, %c0_14] : memref<8x128xf32, #tpu.memory_space<vmem>>, vector<8x128xf32>
      tpu.vector_store %arg5[%c0_13, %c0_14], %21 {strides = array<i32>} : memref<8x128xf32, #tpu.memory_space<vmem>>, vector<8x128xf32>,
    } else {
    }
    %c0 = arith.constant 0 : index
    %c0_1 = arith.constant 0 : index
    %3 = vector.load %arg5[%c0, %c0_1] : memref<8x128xf32, #tpu.memory_space<vmem>>, vector<8x128xf32>
    %c0_2 = arith.constant 0 : index
    %c0_3 = arith.constant 0 : index
    %4 = vector.load %arg2[%c0_2, %c0_3] : memref<16x128xf32, #tpu.memory_space<vmem>>, vector<16x128xf32>
    %c0_4 = arith.constant 0 : index
    %c0_5 = arith.constant 0 : index
    %5 = vector.load %arg3[%c0_4, %c0_5] : memref<16x128xf32, #tpu.memory_space<vmem>>, vector<16x128xf32>
    %cst = arith.constant 1.000000e+00 : f32
    %6 = vector.broadcast %cst : f32 to vector<16x128xf32>
    %7 = arith.addf %4, %6 : vector<16x128xf32>
    %8 = math.log %7 : vector<16x128xf32>
    %cst_6 = arith.constant 1.000000e+00 : f32
    %9 = vector.broadcast %cst_6 : f32 to vector<16x128xf32>
    %10 = arith.addf %5, %9 : vector<16x128xf32>
    %11 = math.log %10 : vector<16x128xf32>
    %12 = arith.subf %8, %11 : vector<16x128xf32>
    %13 = arith.mulf %12, %12 : vector<16x128xf32>
    %14 = vector.shape_cast %13 : vector<16x128xf32> to vector<2x8x128xf32>
    %cst_7 = arith.constant dense<0.000000e+00> : vector<8x128xf32>
    %15 = vector.multi_reduction <add>, %14, %cst_7 [0] : vector<2x8x128xf32> to vector<8x128xf32>
    %16 = arith.addf %3, %15 : vector<8x128xf32>
    %c0_8 = arith.constant 0 : index
    %c0_9 = arith.constant 0 : index
    %17 = vector.load %arg5[%c0_8, %c0_9] : memref<8x128xf32, #tpu.memory_space<vmem>>, vector<8x128xf32>
    tpu.vector_store %arg5[%c0_8, %c0_9], %16 {strides = array<i32>} : memref<8x128xf32, #tpu.memory_space<vmem>>, vector<8x128xf32>,
    %c0_i32_10 = arith.constant 0 : i32
    %18 = arith.cmpi eq, %arg1, %c0_i32_10 : i32
    %19 = arith.extui %18 : i1 to i32
    %c0_i32_11 = arith.constant 0 : i32
    %20 = arith.cmpi ne, %19, %c0_i32_11 : i32
    scf.if %20 {
      %c0_12 = arith.constant 0 : index
      %c0_13 = arith.constant 0 : index
      %21 = vector.load %arg5[%c0_12, %c0_13] : memref<8x128xf32, #tpu.memory_space<vmem>>, vector<8x128xf32>
      %22 = vector.shape_cast %21 : vector<8x128xf32> to vector<1x8x128xf32>
      %cst_14 = arith.constant dense<0.000000e+00> : vector<1xf32>
      %23 = vector.multi_reduction <add>, %22, %cst_14 [1, 2] : vector<1x8x128xf32> to vector<1xf32>
      %24 = vector.shape_cast %23 : vector<1xf32> to vector<1x1x1xf32>
      %25 = vector.extract %24[0, 0, 0] : f32 from vector<1x1x1xf32>
      %26 = vector.broadcast %25 : f32 to vector<1x1xf32>
      %c0_15 = arith.constant 0 : index
      %c0_16 = arith.constant 0 : index
      %27 = vector.load %arg4[%c0_15, %c0_16] : memref<1x1xf32, #tpu.memory_space<vmem>>, vector<1x1xf32>
      tpu.vector_store %arg4[%c0_15, %c0_16], %26 {strides = array<i32>} : memref<1x1xf32, #tpu.memory_space<vmem>>, vector<1x1xf32>,
    } else {
    }
    return
  }
  func.func @transform_0(%arg0: i32, %arg1: i32) -> (i32, i32) {
    %c1_i32 = arith.constant 1 : i32
    %0 = arith.muli %arg0, %c1_i32 : i32
    %1 = arith.addi %0, %arg1 : i32
    %c0_i32 = arith.constant 0 : i32
    %c0_i32_0 = arith.constant 0 : i32
    return %1, %c0_i32 : i32, i32
  }
  func.func @transform_1(%arg0: i32, %arg1: i32) -> (i32, i32) {
    %c1_i32 = arith.constant 1 : i32
    %0 = arith.muli %arg0, %c1_i32 : i32
    %1 = arith.addi %0, %arg1 : i32
    %c0_i32 = arith.constant 0 : i32
    %c0_i32_0 = arith.constant 0 : i32
    return %1, %c0_i32 : i32, i32
  }
  func.func @transform_2(%arg0: i32, %arg1: i32) -> (i32, i32) {
    %c0_i32 = arith.constant 0 : i32
    %c0_i32_0 = arith.constant 0 : i32
    return %arg0, %c0_i32 : i32, i32
  }
}

</mosaic_0001>

<bundles_post_ra>
// kernel: tpu_custom_call.1
= control target key start
LH: loop header
LB: loop body
LE: loop exit
PB: predicated region body
PF: predicated region fallthrough
CT: control target
= control target key end

     0   :  { %7 = vsyncpa [#allocation4], 0  ;;  %s223_s0 = inlined_call_operand.hbm [shape: f32[16,128], index: 0, kind: input, shape index: {}]   ;;  %s224_s1 = inlined_call_operand.hbm [shape: f32[16,128], index: 1, kind: input, shape index: {}]   ;;  %s225_s2 = inlined_call_operand.hbm [shape: f32[1,1], index: 2, kind: output, shape index: {}]  }
   0x1   :  { %8 = vsyncpa [#allocation7], 0 }
   0x2   :  { %9 = vsyncpa [#allocation5], 0  ;;  %s194_s9 = smov [#allocation3]  }
   0x3   :  { %s19_s10 = sshll.u32 %s194_s9, 4  ;;  %s20_s10 = int_to_ptr.vmem [resolvable:$true] %s19_s10 }
   0x4   :  { %s136_s11 = scalar_lea.vmem %s20_s10, 256  ;;  %p141_p1 = scmp.lt.s32.totalorder %s20_s10, %s20_s10 }
   0x5   :  { %p137_p0 = scmp.ne.s32.totalorder %s20_s10, %s136_s11  ;;  %p142_p2 = scmp.lt.s32.totalorder %s136_s11, %s136_s11 }
   0x7   :  { %p143_p3 = por %p142_p2, %p141_p1 }
   0x9   :  { %p144_p4 = pnand %p143_p3, %p137_p0 }
   0xb   :  { %147 = shalt.err (!%p144_p4)
}
   0xc   :  { %s195_s12 = smov 128   ;;  %s196_s13 = smov 8  }
   0xd   :  { %25 = dma.hbm_to_vmem [thread:$0]  %s223_s0, 256, %s20_s10, [#allocation4], %s195_s12, %s195_s12, %s196_s13  }
   0xe   :  { %s197_s16 = smov [#allocation6]  }
   0xf   :  { %s35_s17 = sshll.u32 %s197_s16, 4  ;;  %s36_s17 = int_to_ptr.vmem [resolvable:$true] %s35_s17 }
  0x10   :  { %s156_s18 = scalar_lea.vmem %s36_s17, 256  ;;  %p161_p6 = scmp.lt.s32.totalorder %s36_s17, %s36_s17 }
  0x11   :  { %p157_p5 = scmp.ne.s32.totalorder %s36_s17, %s156_s18  ;;  %p162_p7 = scmp.lt.s32.totalorder %s156_s18, %s156_s18 }
  0x13   :  { %p163_p8 = por %p162_p7, %p161_p6 }
  0x15   :  { %p164_p9 = pnand %p163_p8, %p157_p5 }
  0x17   :  { %167 = shalt.err (!%p164_p9)
}
  0x18   :  { %41 = dma.hbm_to_vmem [thread:$0]  %s224_s1, 256, %s36_s17, [#allocation7], %s195_s12, %s195_s12, %s196_s13  }
  0x19   :  { %188 = dma.done.wait [#allocation4], 256  }
  0x1a   :  { %189 = vsyncadd [#allocation4], 4294967040 }
  0x1b   :  { %190 = dma.done.wait [#allocation7], 256  }
  0x1c   :  { %191 = vsyncadd [#allocation7], 4294967040  ;;  %v58_v0 = vld [vmem:[#allocation3] sm:$0xff]  ;;  %v59_v1 = vld [vmem:[#allocation3 + $0x8] sm:$0xff]  ;;  %s198_s0 = smov [#allocation8]   ;;  %vm95_vm0 = vcmask 0  }
  0x1d   :  { %v60_v2 = vld [vmem:[#allocation6] sm:$0xff]  ;;  %v61_v3 = vld [vmem:[#allocation6 + $0x8] sm:$0xff]  ;;  %v62_v4 = vadd.f32 1.0, %v58_v0  ;;  %v63_v5 = vadd.f32 1.0, %v59_v1  ;;  %s103_s1 = sshll.u32 %s198_s0, 4  ;;  %s104_s1 = int_to_ptr.vmem [resolvable:$true] %s103_s1 }
  0x1e   :  { %v68_v6 = vadd.f32 1.0, %v60_v2  ;;  %v69_v7 = vadd.f32 1.0, %v61_v3  ;;  %s168_s22 = scalar_lea.vmem %s104_s1, 16  ;;  %s172_s23 = scalar_lea.vmem %s104_s1, 32 }
  0x1f   :  { %120 = vlog2.f32 %v62_v4  ;;  %p169_p10 = scmp.ne.s32.totalorder %s104_s1, %s168_s22  ;;  %p173_p11 = scmp.lt.s32.totalorder %s104_s1, %s104_s1 }
  0x20   :  { %122 = vlog2.f32 %v63_v5  ;;  %p174_p12 = scmp.lt.s32.totalorder %s172_s23, %s168_s22 }
  0x21   :  { %124 = vlog2.f32 %v68_v6 }
  0x22   :  { %126 = vlog2.f32 %v69_v7  ;;  %p175_p13 = por %p174_p12, %p173_p11 }
  0x24   :  { %p176_p0 = pnand %p175_p13, %p169_p10 }
  0x2c   :  { %v121_v8 = vpop.eup %120 }
  0x2d   :  { %v123_v9 = vpop.eup %122  ;;  %v65_v10 = vmul.f32 0.6931472, %v121_v8 }
  0x2e   :  { %v125_v11 = vpop.eup %124  ;;  %v67_v12 = vmul.f32 0.6931472, %v123_v9 }
  0x2f   :  { %v127_v13 = vpop.eup %126  ;;  %v71_v14 = vmul.f32 0.6931472, %v125_v11 }
  0x30   :  { %v73_v15 = vmul.f32 0.6931472, %v127_v13 }
  0x31   :  { %v74_v16 = vsub.f32 %v65_v10, %v71_v14 }
  0x32   :  { %v75_v17 = vsub.f32 %v67_v12, %v73_v15 }
  0x33   :  { %v76_v18 = vmul.f32 %v74_v16, %v74_v16 }
  0x34   :  { %v77_v19 = vmul.f32 %v75_v17, %v75_v17 }
  0x36   :  { %v78_v20 = vadd.f32 %v77_v19, %v76_v18 }
  0x38   :  { %85 = vadd.xlane.f32.xlu0 %v78_v20 }
  0xc1   :  { %v86_v21 = vpop.xlane.xlu0 %85 }
  0xc2   :  { %v87_v22 = vrot.slane %v86_v21, 4 }
  0xc4   :  { %v88_v23 = vadd.f32 %v87_v22, %v86_v21 }
  0xc6   :  { %v89_v24 = vrot.slane %v88_v23, 2 }
  0xc8   :  { %v90_v25 = vadd.f32 %v89_v24, %v88_v23 }
  0xca   :  { %v91_v26 = vrot.slane %v90_v25, 1 }
  0xcc   :  { %v92_v27 = vadd.f32 %v91_v26, %v90_v25 }
  0xce   :  { %113 = vpush %v92_v27 }
  0xff   :  { %s114_s21 = spop %113 }
 0x100   :  { %v94_v28 = vstv %s114_s21 }
 0x101   :  { %96 = vst.msk [vmem:[#allocation8] sm:$0x1] %vm95_vm0, %v94_v28 }
 0x102   :  { %179 = shalt.err (!%p176_p0)
}
 0x103   :  { %106 = dma.vmem_to_hbm [thread:$0]  %s104_s1, 16, %s225_s2, [#allocation5]  }
 0x104   :  { %192 = dma.done.wait [#allocation5], 16  }
 0x105   :  { %193 = vsyncadd [#allocation5], 4294967280 }
 0x106   :  { %110 = vsyncpa [#allocation4], 1 }
 0x107   :  { %111 = vsyncpa [#allocation7], 1 }
 0x108   :  { %112 = vsyncpa [#allocation5], 1 }

</bundles_post_ra>
